<compile_context>
chip_gen: v7x
topology: tpu7x:2x2x1
jax: 0.10.0
libtpu: 0.0.40
codegen_flags: <defaults>
</compile_context>

<pallas_src>
import functools

import jax
import jax.numpy as jnp
from jax.experimental import pallas as pl
from jax.experimental.pallas import tpu as pltpu


def _mha_kernel(q_ref, k_ref, v_ref,
                wqt_ref, wkt_ref, wvt_ref, wo_th_ref, bo_ref,
                o_ref, *, heads: int, head_dim: int):
    # Refs per grid step:
    #   q_ref   (1, tq, E)   query tile
    #   k_ref   (1, L,  E)   full keys     (same for v_ref)
    #   wqt/wkt/wvt (E, E)   pre-transposed weights (scale folded into wqt)
    #   wo_th   (H, D, E)    pre-transposed output proj, split per head
    #   bo      (1, E)       output bias (f32)
    #   o_ref   (1, tq, E)
    cdt = wqt_ref.dtype                      # MXU compute dtype (bf16 by default)

    q = q_ref[0].astype(cdt)                 # (tq, E)
    k = k_ref[0].astype(cdt)                 # (L,  E)
    v = v_ref[0].astype(cdt)                 # (L,  E)

    # Lane-dense input projections on the MXU (no in-kernel weight transpose).
    qp = jnp.dot(q, wqt_ref[...], preferred_element_type=jnp.float32)   # (tq, E)
    kp = jnp.dot(k, wkt_ref[...], preferred_element_type=jnp.float32)   # (L,  E)
    vp = jnp.dot(v, wvt_ref[...], preferred_element_type=jnp.float32)   # (L,  E)

    # Per-head attention fused with the output projection; the only store is a
    # single lane-dense (tq, E) write.  Static unroll is fine for small head
    # counts; switch to lax.fori_loop(unroll=True) if heads * L*L grows enough
    # to spill vregs.
    acc = jnp.zeros(qp.shape, jnp.float32)                              # (tq, E)
    for h in range(heads):
        lo = h * head_dim
        hi = lo + head_dim
        qh = qp[:, lo:hi].astype(cdt)        # (tq, D)
        kh = kp[:, lo:hi].astype(cdt)        # (L,  D)
        vh = vp[:, lo:hi].astype(cdt)        # (L,  D)

        # qh @ kh^T without materializing a transpose (MXU takes it directly).
        s = jax.lax.dot_general(qh, kh, (((1,), (1,)), ((), ())),
                                preferred_element_type=jnp.float32)     # (tq, L)

        # Softmax in f32 (scale already folded into wqt).
        m = jnp.max(s, axis=-1, keepdims=True)
        e = jnp.exp(s - m)
        p = e * pl.reciprocal(jnp.sum(e, axis=-1, keepdims=True), approx=True)

        oh = jnp.dot(p.astype(cdt), vh, preferred_element_type=jnp.float32)  # (tq, D)

        # Fused output projection: out = sum_h oh @ wo.T[h*D:(h+1)*D, :] + bias
        acc = acc + jnp.dot(oh.astype(cdt), wo_th_ref[h],
                            preferred_element_type=jnp.float32)              # (tq, E)

    o_ref[0] = (acc + bo_ref[...]).astype(o_ref.dtype)


def linear_multi_head_attention(q, k, v, wq, wk, wv, wo, bo, *, heads: int,
                                q_tile: int = 256,
                                mxu_dtype=jnp.bfloat16):
    """q, k, v: (N, L, E).  wq/wk/wv/wo: (E, E) PyTorch (out,in) layout.  bo: (E,)."""
    N, L, E = q.shape
    assert E % heads == 0, "embedding size must be divisible by heads"
    head_dim = E // heads
    scale = float(E) ** (-0.5)

    # One-time host-side weight prep (ordinary XLA ops, not per-grid-step work):
    #  * transpose to (in, out) so the kernel never transposes,
    #  * fold the softmax scale into the Q projection,
    #  * split wo.T per head along the leading axis for cheap in-kernel indexing,
    #  * cast to the MXU compute dtype.
    wq_t = (wq.T * scale).astype(mxu_dtype)                 # (E, E)
    wk_t = wk.T.astype(mxu_dtype)                           # (E, E)
    wv_t = wv.T.astype(mxu_dtype)                           # (E, E)
    wo_th = wo.T.reshape(heads, head_dim, E).astype(mxu_dtype)   # (H, D, E)
    bo2 = bo.reshape(1, E).astype(jnp.float32)

    # Query-sequence tiling: bounds per-step score size to (tq, L) and adds a
    # second parallel grid axis (pipeline depth / dual-TC work on v7x).
    tq = q_tile if (L % q_tile == 0) else L
    grid = (N, L // tq)

    kernel = functools.partial(_mha_kernel, heads=heads, head_dim=head_dim)

    q_spec = pl.BlockSpec((1, tq, E), lambda n, i: (n, i, 0))
    kv_spec = pl.BlockSpec((1, L, E), lambda n, i: (n, 0, 0))
    w_spec = pl.BlockSpec((E, E), lambda n, i: (0, 0))
    wo_spec = pl.BlockSpec((heads, head_dim, E), lambda n, i: (0, 0, 0))
    b_spec = pl.BlockSpec((1, E), lambda n, i: (0, 0))
    out_spec = pl.BlockSpec((1, tq, E), lambda n, i: (n, i, 0))

    return pl.pallas_call(
        kernel,
        out_shape=jax.ShapeDtypeStruct((N, L, E), q.dtype),
        grid=grid,
        in_specs=[q_spec, kv_spec, kv_spec, w_spec, w_spec, w_spec, wo_spec, b_spec],
        out_specs=out_spec,
        compiler_params=pltpu.CompilerParams(
            dimension_semantics=("parallel", "parallel")),
    )(q, k, v, wq_t, wk_t, wv_t, wo_th, bo2)


def _reference(q, k, v, wq, wk, wv, wo, bo, heads):
    """Pure-JAX (f32) reference mirroring the PyTorch forward."""
    N, L, E = q.shape
    D = E // heads
    qp = q @ wq.T
    kp = k @ wk.T
    vp = v @ wv.T
    qh = qp.reshape(N, L, heads, D)
    kh = kp.reshape(N, L, heads, D)
    vh = vp.reshape(N, L, heads, D)
    qk = jnp.einsum('nqhd,nkhd->nhqk', qh, kh)
    attn = jax.nn.softmax(qk * (E ** -0.5), axis=3)
    out = jnp.einsum('nhql,nlhd->nqhd', attn, vh)
    out = out.reshape(N, L, E)
    return out @ wo.T + bo


if __name__ == "__main__":
    N, L, E, H = 2, 8, 32, 4

    key = jax.random.PRNGKey(0)
    ks = jax.random.split(key, 8)
    q = jax.random.normal(ks[0], (N, L, E), jnp.float32)
    k = jax.random.normal(ks[1], (N, L, E), jnp.float32)
    v = jax.random.normal(ks[2], (N, L, E), jnp.float32)

    # Deterministic parameter init (shapes from the module's __init__).
    init_scale = 1.0 / jnp.sqrt(E)
    wq = jax.random.uniform(ks[3], (E, E), jnp.float32, -init_scale, init_scale)
    wk = jax.random.uniform(ks[4], (E, E), jnp.float32, -init_scale, init_scale)
    wv = jax.random.uniform(ks[5], (E, E), jnp.float32, -init_scale, init_scale)
    wo = jax.random.uniform(ks[6], (E, E), jnp.float32, -init_scale, init_scale)
    bo = jax.random.uniform(ks[7], (E,), jnp.float32, -init_scale, init_scale)

    ref = _reference(q, k, v, wq, wk, wv, wo, bo, H)

    # 1) f32 compute mode: validates the kernel structure tightly against the
    #    f32 reference (tolerance covers the approx EUP reciprocal).
    out_f32 = linear_multi_head_attention(
        q, k, v, wq, wk, wv, wo, bo, heads=H, mxu_dtype=jnp.float32)
    out_f32 = jax.block_until_ready(out_f32)
    assert out_f32.shape == (N, L, E)
    assert jnp.allclose(out_f32, ref, atol=2e-3, rtol=2e-3), "f32 kernel mismatch"

    # 2) Default bf16 MXU path: relaxed tolerance vs. the f32 reference.
    out_bf16 = linear_multi_head_attention(q, k, v, wq, wk, wv, wo, bo, heads=H)
    out_bf16 = jax.block_until_ready(out_bf16)
    assert out_bf16.shape == (N, L, E)
    assert jnp.allclose(out_bf16, ref, atol=5e-2, rtol=5e-2), "bf16 kernel mismatch"

    print("KERNEL_OK")
</pallas_src>

<mosaic_0001>
module attributes {stable_mosaic.version = 11 : i64} {
  func.func @_mha_kernel(%arg0: i32, %arg1: i32, %arg2: memref<1x8x32xf32, #tpu.memory_space<vmem>>, %arg3: memref<1x8x32xf32, #tpu.memory_space<vmem>>, %arg4: memref<1x8x32xf32, #tpu.memory_space<vmem>>, %arg5: memref<32x32xf32, #tpu.memory_space<vmem>>, %arg6: memref<32x32xf32, #tpu.memory_space<vmem>>, %arg7: memref<32x32xf32, #tpu.memory_space<vmem>>, %arg8: memref<4x8x32xf32, #tpu.memory_space<vmem>>, %arg9: memref<1x32xf32, #tpu.memory_space<vmem>>, %arg10: memref<1x8x32xf32, #tpu.memory_space<vmem>>) attributes {dimension_semantics = [#tpu.dimension_semantics<parallel>, #tpu.dimension_semantics<parallel>], iteration_bounds = array<i64: 2, 1>, scalar_prefetch = 0 : i64, scratch_operands = 0 : i64, tpu.core_type = #tpu.core_type<tc>, window_params = [{transform_indices = @transform_0, window_bounds = array<i64: 1, 8, 32>}, {transform_indices = @transform_1, window_bounds = array<i64: 1, 8, 32>}, {transform_indices = @transform_2, window_bounds = array<i64: 1, 8, 32>}, {pipeline_mode = #tpu.pipeline_mode<synchronous>, transform_indices = @transform_3, window_bounds = array<i64: 32, 32>}, {pipeline_mode = #tpu.pipeline_mode<synchronous>, transform_indices = @transform_4, window_bounds = array<i64: 32, 32>}, {pipeline_mode = #tpu.pipeline_mode<synchronous>, transform_indices = @transform_5, window_bounds = array<i64: 32, 32>}, {pipeline_mode = #tpu.pipeline_mode<synchronous>, transform_indices = @transform_6, window_bounds = array<i64: 4, 8, 32>}, {pipeline_mode = #tpu.pipeline_mode<synchronous>, transform_indices = @transform_7, window_bounds = array<i64: 1, 32>}, {transform_indices = @transform_8, window_bounds = array<i64: 1, 8, 32>}]} {
    %c0 = arith.constant 0 : index
    %c0_0 = arith.constant 0 : index
    %c0_1 = arith.constant 0 : index
    %0 = vector.load %arg2[%c0, %c0_0, %c0_1] : memref<1x8x32xf32, #tpu.memory_space<vmem>>, vector<1x8x32xf32>
    %1 = vector.shape_cast %0 : vector<1x8x32xf32> to vector<8x32xf32>
    %c0_2 = arith.constant 0 : index
    %c0_3 = arith.constant 0 : index
    %c0_4 = arith.constant 0 : index
    %2 = vector.load %arg3[%c0_2, %c0_3, %c0_4] : memref<1x8x32xf32, #tpu.memory_space<vmem>>, vector<1x8x32xf32>
    %3 = vector.shape_cast %2 : vector<1x8x32xf32> to vector<8x32xf32>
    %c0_5 = arith.constant 0 : index
    %c0_6 = arith.constant 0 : index
    %c0_7 = arith.constant 0 : index
    %4 = vector.load %arg4[%c0_5, %c0_6, %c0_7] : memref<1x8x32xf32, #tpu.memory_space<vmem>>, vector<1x8x32xf32>
    %5 = vector.shape_cast %4 : vector<1x8x32xf32> to vector<8x32xf32>
    %c0_8 = arith.constant 0 : index
    %c0_9 = arith.constant 0 : index
    %6 = vector.load %arg5[%c0_8, %c0_9] : memref<32x32xf32, #tpu.memory_space<vmem>>, vector<32x32xf32>
    %cst = arith.constant dense<0.000000e+00> : vector<8x32xf32>
    %7 = tpu.matmul %1, %6, %cst {dimension_numbers = #tpu.dot_dimension_numbers<[1], [0], [0], [1], [0, 0, 1, 1], [], []>} : vector<8x32xf32>, vector<32x32xf32>, vector<8x32xf32> -> vector<8x32xf32>
    %c0_10 = arith.constant 0 : index
    %c0_11 = arith.constant 0 : index
    %8 = vector.load %arg6[%c0_10, %c0_11] : memref<32x32xf32, #tpu.memory_space<vmem>>, vector<32x32xf32>
    %cst_12 = arith.constant dense<0.000000e+00> : vector<8x32xf32>
    %9 = tpu.matmul %3, %8, %cst_12 {dimension_numbers = #tpu.dot_dimension_numbers<[1], [0], [0], [1], [0, 0, 1, 1], [], []>} : vector<8x32xf32>, vector<32x32xf32>, vector<8x32xf32> -> vector<8x32xf32>
    %c0_13 = arith.constant 0 : index
    %c0_14 = arith.constant 0 : index
    %10 = vector.load %arg7[%c0_13, %c0_14] : memref<32x32xf32, #tpu.memory_space<vmem>>, vector<32x32xf32>
    %cst_15 = arith.constant dense<0.000000e+00> : vector<8x32xf32>
    %11 = tpu.matmul %5, %10, %cst_15 {dimension_numbers = #tpu.dot_dimension_numbers<[1], [0], [0], [1], [0, 0, 1, 1], [], []>} : vector<8x32xf32>, vector<32x32xf32>, vector<8x32xf32> -> vector<8x32xf32>
    %cst_16 = arith.constant 0.000000e+00 : f32
    %12 = vector.broadcast %cst_16 : f32 to vector<8x32xf32>
    %13 = vector.extract_strided_slice %7 {offsets = [0, 0], sizes = [8, 8], strides = [1, 1]} : vector<8x32xf32> to vector<8x8xf32>
    %14 = vector.extract_strided_slice %9 {offsets = [0, 0], sizes = [8, 8], strides = [1, 1]} : vector<8x32xf32> to vector<8x8xf32>
    %15 = vector.extract_strided_slice %11 {offsets = [0, 0], sizes = [8, 8], strides = [1, 1]} : vector<8x32xf32> to vector<8x8xf32>
    %cst_17 = arith.constant dense<0.000000e+00> : vector<8x8xf32>
    %16 = tpu.matmul %13, %14, %cst_17 {dimension_numbers = #tpu.dot_dimension_numbers<[1], [1], [0], [0], [0, 0, 1, 0], [], []>} : vector<8x8xf32>, vector<8x8xf32>, vector<8x8xf32> -> vector<8x8xf32>
    %cst_18 = arith.constant dense<0xFF800000> : vector<8xf32>
    %17 = vector.multi_reduction <maximumf>, %16, %cst_18 [1] : vector<8x8xf32> to vector<8xf32>
    %18 = vector.shape_cast %17 : vector<8xf32> to vector<8x1xf32>
    %19 = vector.broadcast %18 : vector<8x1xf32> to vector<8x8xf32>
    %20 = arith.subf %16, %19 : vector<8x8xf32>
    %21 = math.exp %20 : vector<8x8xf32>
    %cst_19 = arith.constant dense<0.000000e+00> : vector<8xf32>
    %22 = vector.multi_reduction <add>, %21, %cst_19 [1] : vector<8x8xf32> to vector<8xf32>
    %23 = vector.shape_cast %22 : vector<8xf32> to vector<8x1xf32>
    %24 = tpu.reciprocal %23 {approx = true} : vector<8x1xf32> -> vector<8x1xf32>
    %25 = vector.broadcast %24 : vector<8x1xf32> to vector<8x8xf32>
    %26 = arith.mulf %21, %25 : vector<8x8xf32>
    %cst_20 = arith.constant dense<0.000000e+00> : vector<8x8xf32>
    %27 = tpu.matmul %26, %15, %cst_20 {dimension_numbers = #tpu.dot_dimension_numbers<[1], [0], [0], [1], [0, 0, 1, 1], [], []>} : vector<8x8xf32>, vector<8x8xf32>, vector<8x8xf32> -> vector<8x8xf32>
    %c0_21 = arith.constant 0 : index
    %c0_22 = arith.constant 0 : index
    %c0_23 = arith.constant 0 : index
    %28 = vector.load %arg8[%c0_21, %c0_22, %c0_23] : memref<4x8x32xf32, #tpu.memory_space<vmem>>, vector<1x8x32xf32>
    %29 = vector.shape_cast %28 : vector<1x8x32xf32> to vector<8x32xf32>
    %cst_24 = arith.constant dense<0.000000e+00> : vector<8x32xf32>
    %30 = tpu.matmul %27, %29, %cst_24 {dimension_numbers = #tpu.dot_dimension_numbers<[1], [0], [0], [1], [0, 0, 1, 1], [], []>} : vector<8x8xf32>, vector<8x32xf32>, vector<8x32xf32> -> vector<8x32xf32>
    %31 = arith.addf %12, %30 : vector<8x32xf32>
    %32 = vector.extract_strided_slice %7 {offsets = [0, 8], sizes = [8, 8], strides = [1, 1]} : vector<8x32xf32> to vector<8x8xf32>
    %33 = vector.extract_strided_slice %9 {offsets = [0, 8], sizes = [8, 8], strides = [1, 1]} : vector<8x32xf32> to vector<8x8xf32>
    %34 = vector.extract_strided_slice %11 {offsets = [0, 8], sizes = [8, 8], strides = [1, 1]} : vector<8x32xf32> to vector<8x8xf32>
    %cst_25 = arith.constant dense<0.000000e+00> : vector<8x8xf32>
    %35 = tpu.matmul %32, %33, %cst_25 {dimension_numbers = #tpu.dot_dimension_numbers<[1], [1], [0], [0], [0, 0, 1, 0], [], []>} : vector<8x8xf32>, vector<8x8xf32>, vector<8x8xf32> -> vector<8x8xf32>
    %cst_26 = arith.constant dense<0xFF800000> : vector<8xf32>
    %36 = vector.multi_reduction <maximumf>, %35, %cst_26 [1] : vector<8x8xf32> to vector<8xf32>
    %37 = vector.shape_cast %36 : vector<8xf32> to vector<8x1xf32>
    %38 = vector.broadcast %37 : vector<8x1xf32> to vector<8x8xf32>
    %39 = arith.subf %35, %38 : vector<8x8xf32>
    %40 = math.exp %39 : vector<8x8xf32>
    %cst_27 = arith.constant dense<0.000000e+00> : vector<8xf32>
    %41 = vector.multi_reduction <add>, %40, %cst_27 [1] : vector<8x8xf32> to vector<8xf32>
    %42 = vector.shape_cast %41 : vector<8xf32> to vector<8x1xf32>
    %43 = tpu.reciprocal %42 {approx = true} : vector<8x1xf32> -> vector<8x1xf32>
    %44 = vector.broadcast %43 : vector<8x1xf32> to vector<8x8xf32>
    %45 = arith.mulf %40, %44 : vector<8x8xf32>
    %cst_28 = arith.constant dense<0.000000e+00> : vector<8x8xf32>
    %46 = tpu.matmul %45, %34, %cst_28 {dimension_numbers = #tpu.dot_dimension_numbers<[1], [0], [0], [1], [0, 0, 1, 1], [], []>} : vector<8x8xf32>, vector<8x8xf32>, vector<8x8xf32> -> vector<8x8xf32>
    %c1 = arith.constant 1 : index
    %c0_29 = arith.constant 0 : index
    %c0_30 = arith.constant 0 : index
    %47 = vector.load %arg8[%c1, %c0_29, %c0_30] : memref<4x8x32xf32, #tpu.memory_space<vmem>>, vector<1x8x32xf32>
    %48 = vector.shape_cast %47 : vector<1x8x32xf32> to vector<8x32xf32>
    %cst_31 = arith.constant dense<0.000000e+00> : vector<8x32xf32>
    %49 = tpu.matmul %46, %48, %cst_31 {dimension_numbers = #tpu.dot_dimension_numbers<[1], [0], [0], [1], [0, 0, 1, 1], [], []>} : vector<8x8xf32>, vector<8x32xf32>, vector<8x32xf32> -> vector<8x32xf32>
    %50 = arith.addf %31, %49 : vector<8x32xf32>
    %51 = vector.extract_strided_slice %7 {offsets = [0, 16], sizes = [8, 8], strides = [1, 1]} : vector<8x32xf32> to vector<8x8xf32>
    %52 = vector.extract_strided_slice %9 {offsets = [0, 16], sizes = [8, 8], strides = [1, 1]} : vector<8x32xf32> to vector<8x8xf32>
    %53 = vector.extract_strided_slice %11 {offsets = [0, 16], sizes = [8, 8], strides = [1, 1]} : vector<8x32xf32> to vector<8x8xf32>
    %cst_32 = arith.constant dense<0.000000e+00> : vector<8x8xf32>
    %54 = tpu.matmul %51, %52, %cst_32 {dimension_numbers = #tpu.dot_dimension_numbers<[1], [1], [0], [0], [0, 0, 1, 0], [], []>} : vector<8x8xf32>, vector<8x8xf32>, vector<8x8xf32> -> vector<8x8xf32>
    %cst_33 = arith.constant dense<0xFF800000> : vector<8xf32>
    %55 = vector.multi_reduction <maximumf>, %54, %cst_33 [1] : vector<8x8xf32> to vector<8xf32>
    %56 = vector.shape_cast %55 : vector<8xf32> to vector<8x1xf32>
    %57 = vector.broadcast %56 : vector<8x1xf32> to vector<8x8xf32>
    %58 = arith.subf %54, %57 : vector<8x8xf32>
    %59 = math.exp %58 : vector<8x8xf32>
    %cst_34 = arith.constant dense<0.000000e+00> : vector<8xf32>
    %60 = vector.multi_reduction <add>, %59, %cst_34 [1] : vector<8x8xf32> to vector<8xf32>
    %61 = vector.shape_cast %60 : vector<8xf32> to vector<8x1xf32>
    %62 = tpu.reciprocal %61 {approx = true} : vector<8x1xf32> -> vector<8x1xf32>
    %63 = vector.broadcast %62 : vector<8x1xf32> to vector<8x8xf32>
    %64 = arith.mulf %59, %63 : vector<8x8xf32>
    %cst_35 = arith.constant dense<0.000000e+00> : vector<8x8xf32>
    %65 = tpu.matmul %64, %53, %cst_35 {dimension_numbers = #tpu.dot_dimension_numbers<[1], [0], [0], [1], [0, 0, 1, 1], [], []>} : vector<8x8xf32>, vector<8x8xf32>, vector<8x8xf32> -> vector<8x8xf32>
    %c2 = arith.constant 2 : index
    %c0_36 = arith.constant 0 : index
    %c0_37 = arith.constant 0 : index
    %66 = vector.load %arg8[%c2, %c0_36, %c0_37] : memref<4x8x32xf32, #tpu.memory_space<vmem>>, vector<1x8x32xf32>
    %67 = vector.shape_cast %66 : vector<1x8x32xf32> to vector<8x32xf32>
    %cst_38 = arith.constant dense<0.000000e+00> : vector<8x32xf32>
    %68 = tpu.matmul %65, %67, %cst_38 {dimension_numbers = #tpu.dot_dimension_numbers<[1], [0], [0], [1], [0, 0, 1, 1], [], []>} : vector<8x8xf32>, vector<8x32xf32>, vector<8x32xf32> -> vector<8x32xf32>
    %69 = arith.addf %50, %68 : vector<8x32xf32>
    %70 = vector.extract_strided_slice %7 {offsets = [0, 24], sizes = [8, 8], strides = [1, 1]} : vector<8x32xf32> to vector<8x8xf32>
    %71 = vector.extract_strided_slice %9 {offsets = [0, 24], sizes = [8, 8], strides = [1, 1]} : vector<8x32xf32> to vector<8x8xf32>
    %72 = vector.extract_strided_slice %11 {offsets = [0, 24], sizes = [8, 8], strides = [1, 1]} : vector<8x32xf32> to vector<8x8xf32>
    %cst_39 = arith.constant dense<0.000000e+00> : vector<8x8xf32>
    %73 = tpu.matmul %70, %71, %cst_39 {dimension_numbers = #tpu.dot_dimension_numbers<[1], [1], [0], [0], [0, 0, 1, 0], [], []>} : vector<8x8xf32>, vector<8x8xf32>, vector<8x8xf32> -> vector<8x8xf32>
    %cst_40 = arith.constant dense<0xFF800000> : vector<8xf32>
    %74 = vector.multi_reduction <maximumf>, %73, %cst_40 [1] : vector<8x8xf32> to vector<8xf32>
    %75 = vector.shape_cast %74 : vector<8xf32> to vector<8x1xf32>
    %76 = vector.broadcast %75 : vector<8x1xf32> to vector<8x8xf32>
    %77 = arith.subf %73, %76 : vector<8x8xf32>
    %78 = math.exp %77 : vector<8x8xf32>
    %cst_41 = arith.constant dense<0.000000e+00> : vector<8xf32>
    %79 = vector.multi_reduction <add>, %78, %cst_41 [1] : vector<8x8xf32> to vector<8xf32>
    %80 = vector.shape_cast %79 : vector<8xf32> to vector<8x1xf32>
    %81 = tpu.reciprocal %80 {approx = true} : vector<8x1xf32> -> vector<8x1xf32>
    %82 = vector.broadcast %81 : vector<8x1xf32> to vector<8x8xf32>
    %83 = arith.mulf %78, %82 : vector<8x8xf32>
    %cst_42 = arith.constant dense<0.000000e+00> : vector<8x8xf32>
    %84 = tpu.matmul %83, %72, %cst_42 {dimension_numbers = #tpu.dot_dimension_numbers<[1], [0], [0], [1], [0, 0, 1, 1], [], []>} : vector<8x8xf32>, vector<8x8xf32>, vector<8x8xf32> -> vector<8x8xf32>
    %c3 = arith.constant 3 : index
    %c0_43 = arith.constant 0 : index
    %c0_44 = arith.constant 0 : index
    %85 = vector.load %arg8[%c3, %c0_43, %c0_44] : memref<4x8x32xf32, #tpu.memory_space<vmem>>, vector<1x8x32xf32>
    %86 = vector.shape_cast %85 : vector<1x8x32xf32> to vector<8x32xf32>
    %cst_45 = arith.constant dense<0.000000e+00> : vector<8x32xf32>
    %87 = tpu.matmul %84, %86, %cst_45 {dimension_numbers = #tpu.dot_dimension_numbers<[1], [0], [0], [1], [0, 0, 1, 1], [], []>} : vector<8x8xf32>, vector<8x32xf32>, vector<8x32xf32> -> vector<8x32xf32>
    %88 = arith.addf %69, %87 : vector<8x32xf32>
    %c0_46 = arith.constant 0 : index
    %c0_47 = arith.constant 0 : index
    %89 = vector.load %arg9[%c0_46, %c0_47] : memref<1x32xf32, #tpu.memory_space<vmem>>, vector<1x32xf32>
    %90 = vector.broadcast %89 : vector<1x32xf32> to vector<8x32xf32>
    %91 = arith.addf %88, %90 : vector<8x32xf32>
    %c0_48 = arith.constant 0 : index
    %c0_49 = arith.constant 0 : index
    %c0_50 = arith.constant 0 : index
    %92 = vector.load %arg10[%c0_48, %c0_49, %c0_50] : memref<1x8x32xf32, #tpu.memory_space<vmem>>, vector<1x8x32xf32>
    %93 = vector.shape_cast %92 : vector<1x8x32xf32> to vector<8x32xf32>
    %94 = vector.shape_cast %91 : vector<8x32xf32> to vector<1x8x32xf32>
    tpu.vector_store %arg10[%c0_48, %c0_49, %c0_50], %94 {strides = array<i32>} : memref<1x8x32xf32, #tpu.memory_space<vmem>>, vector<1x8x32xf32>,
    return
  }
  func.func @transform_0(%arg0: i32, %arg1: i32) -> (i32, i32, i32) {
    %c0_i32 = arith.constant 0 : i32
    %c0_i32_0 = arith.constant 0 : i32
    return %arg0, %arg1, %c0_i32 : i32, i32, i32
  }
  func.func @transform_1(%arg0: i32, %arg1: i32) -> (i32, i32, i32) {
    %c0_i32 = arith.constant 0 : i32
    %c0_i32_0 = arith.constant 0 : i32
    %c0_i32_1 = arith.constant 0 : i32
    return %arg0, %c0_i32, %c0_i32_0 : i32, i32, i32
  }
  func.func @transform_2(%arg0: i32, %arg1: i32) -> (i32, i32, i32) {
    %c0_i32 = arith.constant 0 : i32
    %c0_i32_0 = arith.constant 0 : i32
    %c0_i32_1 = arith.constant 0 : i32
    return %arg0, %c0_i32, %c0_i32_0 : i32, i32, i32
  }
  func.func @transform_3(%arg0: i32, %arg1: i32) -> (i32, i32) {
    %c0_i32 = arith.constant 0 : i32
    %c0_i32_0 = arith.constant 0 : i32
    %c0_i32_1 = arith.constant 0 : i32
    return %c0_i32, %c0_i32_0 : i32, i32
  }
  func.func @transform_4(%arg0: i32, %arg1: i32) -> (i32, i32) {
    %c0_i32 = arith.constant 0 : i32
    %c0_i32_0 = arith.constant 0 : i32
    %c0_i32_1 = arith.constant 0 : i32
    return %c0_i32, %c0_i32_0 : i32, i32
  }
  func.func @transform_5(%arg0: i32, %arg1: i32) -> (i32, i32) {
    %c0_i32 = arith.constant 0 : i32
    %c0_i32_0 = arith.constant 0 : i32
    %c0_i32_1 = arith.constant 0 : i32
    return %c0_i32, %c0_i32_0 : i32, i32
  }
  func.func @transform_6(%arg0: i32, %arg1: i32) -> (i32, i32, i32) {
    %c0_i32 = arith.constant 0 : i32
    %c0_i32_0 = arith.constant 0 : i32
    %c0_i32_1 = arith.constant 0 : i32
    %c0_i32_2 = arith.constant 0 : i32
    return %c0_i32, %c0_i32_0, %c0_i32_1 : i32, i32, i32
  }
  func.func @transform_7(%arg0: i32, %arg1: i32) -> (i32, i32) {
    %c0_i32 = arith.constant 0 : i32
    %c0_i32_0 = arith.constant 0 : i32
    %c0_i32_1 = arith.constant 0 : i32
    return %c0_i32, %c0_i32_0 : i32, i32
  }
  func.func @transform_8(%arg0: i32, %arg1: i32) -> (i32, i32, i32) {
    %c0_i32 = arith.constant 0 : i32
    %c0_i32_0 = arith.constant 0 : i32
    return %arg0, %arg1, %c0_i32 : i32, i32, i32
  }
}

</mosaic_0001>

<bundles_post_ra>
// kernel: tpu_custom_call.1
= control target key start
LH: loop header
LB: loop body
LE: loop exit
PB: predicated region body
PF: predicated region fallthrough
CT: control target
= control target key end

     0   :  { %s3017_s0 = inlined_call_operand.hbm [shape: f32[2,8,32], index: 0, kind: input, shape index: {}]   ;;  %s3018_s1 = inlined_call_operand.hbm [shape: f32[2,8,32], index: 1, kind: input, shape index: {}]   ;;  %s3019_s2 = inlined_call_operand.hbm [shape: f32[2,8,32], index: 2, kind: input, shape index: {}]   ;;  %s3020_s3 = inlined_call_operand.hbm [shape: f32[32,32], index: 3, kind: input, shape index: {}]   ;;  %s3021_s4 = inlined_call_operand.hbm [shape: f32[32,32], index: 4, kind: input, shape index: {}]   ;;  %s3022_s5 = inlined_call_operand.hbm [shape: f32[32,32], index: 5, kind: input, shape index: {}]   ;;  %s3023_s6 = inlined_call_operand.hbm [shape: f32[4,8,32], index: 6, kind: input, shape index: {}]   ;;  %s3024_s7 = inlined_call_operand.vmem [shape: f32[1,32], index: 7, kind: input, shape index: {}]   ;;  %s3025_s8 = inlined_call_operand.hbm [shape: f32[2,8,32], index: 8, kind: output, shape index: {}]  }
   0x1   :  { %3050 = sst [smem:[#allocation26_spill]] %s3018_s1 }
   0x2   :  { %3051 = sst [smem:[#allocation27_spill]] %s3020_s3 }
   0x3   :  { %3052 = sst [smem:[#allocation28_spill]] %s3022_s5 }
   0x4   :  { %3053 = sst [smem:[#allocation29_spill]] %s3024_s7 }
   0x5   :  { %3054 = sst [smem:[#allocation30_spill]] %s3025_s8 }
   0x6   :  { %13 = vsyncpa [#allocation3], 0 }
   0x7   :  { %15 = vsyncpa [#allocation3 + $0x1], 0 }
   0x8   :  { %16 = vsyncpa [#allocation6], 0 }
   0x9   :  { %18 = vsyncpa [#allocation6 + $0x1], 0 }
   0xa   :  { %19 = vsyncpa [#allocation9], 0 }
   0xb   :  { %20 = vsyncpa [#allocation12], 0 }
   0xc   :  { %21 = vsyncpa [#allocation4], 0 }
   0xd   :  { %23 = vsyncpa [#allocation4 + $0x1], 0  ;;  %s2538_s27 = smov 0   ;;  %s2540_s28 = smov 0  }
   0xe   :  { %s2542_s29 = smov 0   ;;  %s2544_s30 = smov 0  }
   0xf   :  { %s2546_s9 = smov 0   ;;  %s2548_s10 = smov 0  }
  0x10 LB: > { %3055 = sst [smem:[#allocation20_spill]] %s2455_s27  ;;  %s2569_s11 = sadd.s32 4294967295, %s2475_s10   ;;  %s2475_s10 = sphi %s2548_s10, %s29_s10   ;;  %s2471_s9 = sphi %s2546_s9, %s3097_s9   ;;  %s2467_s30 = sphi %s2544_s30, %s3096_s30   ;;  %s2463_s29 = sphi %s2542_s29, %s3100_s29   ;;  %s2459_s28 = sphi %s2540_s28, %s3099_s28   ;;  %s2455_s27 = sphi %s2538_s27, %s3098_s27  }
  0x11   : > { %3056 = sst [smem:[#allocation21_spill]] %s2471_s9  ;;  %p1847_p0 = scmp.ge.s32.totalorder %s2475_s10, 1 }
  0x12   : > { %3057 = sst [smem:[#allocation22_spill]] %s2475_s10  ;;  %p3036_p1 = scmp.eq.s32.totalorder %s2569_s11, 0 }
  0x13   : > { %p259_p2 = scmp.lt.s32.totalorder %s2475_s10, 3  ;;  %s2477_s13 = smov [#allocation8]  }
  0x14   : > { %s271_s14 = sshll.u32 %s2477_s13, 4  ;;  %s2478_s16 = smov [#allocation11]   ;;  %s2578_s14 = int_to_ptr.vmem [resolvable:$true] %s271_s14 }
  0x15   : > { %p2574_p3 = pnand %p1847_p0, %p259_p2  ;;  %s297_s17 = sshll.u32 %s2478_s16, 4  ;;  %s2589_s17 = int_to_ptr.vmem [resolvable:$true] %s297_s17 }
  0x16   : > { %s3060_s3 = sld [smem:[#allocation27_spill]] }
  0x17   : > { %s3058_s12 = scalar_select %p2574_p3, 1, 0 }
  0x18   : > { %p2066_p4 = pneg %p2574_p3 }
  0x1a   : > { %p2585_p6 = pnand %p2066_p4, %p3036_p1 }
  0x1c   : > { %s3059_s15 = scalar_select %p2585_p6, 1, 0 }
  0x1d   : > { %s2179_s20 = scalar_lea.hbm %s3060_s3, 512  ;;  %p2599_p8 = pneg %p2585_p6 }
  0x1e   : > { %p2180_p7 = scmp.ne.s32.totalorder %s3060_s3, %s2179_s20  ;;  %p2186_p11 = scmp.lt.u32.totalorder %s2179_s20, %s3060_s3 }
  0x1f   : > { %s3061_s23 = scalar_select %p2599_p8, 1, 0 }
  0x20   : > { %p2182_p9 = pnand %p2599_p8, %p2180_p7 }
  0x22   : > { %p2183_p10 = pneg %p2182_p9 }
  0x24   : > { %p2188_p12 = pnand %p2186_p11, %p2183_p10 }
  0x26   : > { %2191 = shalt.err (!%p2188_p12)
}
  0x27   : > { %s2192_s26 = scalar_lea.vmem %s2578_s14, 512  ;;  %p2200_p4 = scmp.lt.s32.totalorder %s2578_s14, %s2578_s14 }
  0x28   : > { %p2193_p13 = scmp.ne.s32.totalorder %s2578_s14, %s2192_s26  ;;  %p2201_p5 = scmp.lt.s32.totalorder %s2192_s26, %s2192_s26 }
  0x2a   : > { %p2195_p0 = pnand %p2193_p13, %p2599_p8  ;;  %p2202_p7 = por %p2201_p5, %p2200_p4 }
  0x2c   : > { %p2196_p2 = pneg %p2195_p0 }
  0x2e   : > { %p2203_p9 = pnand %p2202_p7, %p2196_p2 }
  0x30   : > { %2206 = shalt.err (!%p2203_p9)
}
  0x31   : > { %s3027_s13 = smov 128   ;;  %s3029_s16 = smov 8  }
  0x32   : > { %2069 = dma.hbm_to_vmem [thread:$0]  (!%p2585_p6), %s3060_s3, 512, %s2578_s14, [#allocation9], %s3027_s13, %s3027_s13, %s3029_s16  }
  0x33   : > { %s3062_s5 = sld [smem:[#allocation28_spill]] }
  0x39   : > { %s2207_s22 = scalar_lea.hbm %s3062_s5, 512 }
  0x3a   : > { %p2208_p5 = scmp.ne.s32.totalorder %s3062_s5, %s2207_s22  ;;  %p2214_p12 = scmp.lt.u32.totalorder %s2207_s22, %s3062_s5 }
  0x3c   : > { %p2210_p10 = pnand %p2208_p5, %p2599_p8 }
  0x3e   : > { %p2211_p11 = pneg %p2210_p10 }
  0x40   : > { %p2216_p13 = pnand %p2214_p12, %p2211_p11 }
  0x42   : > { %2219 = shalt.err (!%p2216_p13)
}
  0x43   : > { %s2220_s14 = scalar_lea.vmem %s2589_s17, 512  ;;  %p2228_p7 = scmp.lt.s32.totalorder %s2589_s17, %s2589_s17 }
  0x44   : > { %p2221_p0 = scmp.ne.s32.totalorder %s2589_s17, %s2220_s14  ;;  %p2229_p9 = scmp.lt.s32.totalorder %s2220_s14, %s2220_s14 }
  0x46   : > { %p2223_p2 = pnand %p2221_p0, %p2599_p8  ;;  %p2230_p5 = por %p2229_p9, %p2228_p7 }
  0x48   : > { %p2224_p4 = pneg %p2223_p2 }
  0x4a   : > { %p2231_p10 = pnand %p2230_p5, %p2224_p4 }
  0x4c   : > { %2234 = shalt.err (!%p2231_p10)
}
  0x4d   : > { %2075 = dma.hbm_to_vmem [thread:$0]  (!%p2585_p6), %s3062_s5, 512, %s2589_s17, [#allocation12], %s3027_s13, %s3027_s13, %s3029_s16  }
  0x4e   : > { %s1846_s19 = sadd.s32 4294967294, %s2475_s10   ;;  %s41_s20 = sadd.s32 1, %s2471_s9 }
  0x4f   : > { %p43_p11 = scmp.ge.s32.totalorder %s41_s20, 2  ;;  %s50_s21 = sadd.s32 1, %s2463_s29 }
  0x50   : > { %p57_p12 = scmp.ne.s32.totalorder %s2463_s29, %s2459_s28  ;;  %p58_p13 = scmp.eq.s32.totalorder %s2475_s10, 0 }
  0x51   : > { %s3102_s20 = smov (%p43_p11, %s41_s20), 0  ;;  %p63_p2 = scmp.ne.s32.totalorder %s2459_s28, %s2455_s27 }
  0x52   : > { %3063 = sst [smem:[#allocation23_spill]] %s3102_s20  ;;  %p2657_p0 = por %p58_p13, %p57_p12 }
  0x53   : > { %s45_s17 = ssub.s32 %s2471_s9, %s3102_s20  ;;  %p246_p4 = scmp.eq.s32.totalorder %s2569_s11, 1 }
  0x54   : > { %p48_p7 = scmp.eq.s32.totalorder %s45_s17, 0  ;;  %p2668_p9 = por %p3036_p1, %p63_p2 }
  0x55   : > { %p2672_p5 = por %p246_p4, %p57_p12  ;;  %p252_p10 = scmp.eq.s32.totalorder %s1846_s19, 1 }
  0x56   : > { %s3065_s24 = scalar_select %p2668_p9, 1, 0 }
  0x57   : > { %s3066_s25 = scalar_select %p2672_p5, 1, 0 }
  0x58   : > { %s2677_s26 = scalar_select %p48_p7, %s2463_s29, %s50_s21  }
  0x59   : > { %p2679_p11 = por %p252_p10, %p63_p2  ;;  %p2097_p13 = scmp.lt.s32.totalorder %s2475_s10, 2 }
  0x5a   : > { %3067 = sst [smem:[#allocation24_spill]] %s2677_s26  ;;  %s3031_s8 = sand.u32 1, %s2463_s29  }
  0x5b   : > { %s3068_s14 = scalar_select %p2679_p11, 1, 0 }
  0x5c   : > { %s2686_s18 = sshll.u32 %s2471_s9, 7  ;;  %s2690_s17 = sshll.u32 %s3031_s8, 3 }
  0x5d   : > { %3069 = sst [smem:[#allocation25_spill]] %s3068_s14  ;;  %p2694_p12 = pnand %p2097_p13, %p2657_p0 }
  0x5e   : > { %s346_s19 = sand.u32 1, %s2475_s10   ;;  %s3071_s1 = sld [smem:[#allocation26_spill]] }
  0x5f   : > { %s3070_s13 = scalar_select %p2694_p12, 1, 0 }
  0x60   : > { %s350_s5 = scalar_lea.vmem [#allocation5], %s2690_s17  ;;  %s2708_s22 = scalar_lea.sflag [#allocation6], %s346_s19 }
  0x61   : > { %s357_s8 = sshll.u32 %s350_s5, 4  ;;  %p2714_p2 = pneg %p2694_p12  ;;  %s2706_s8 = int_to_ptr.vmem [resolvable:$true] %s357_s8 }
  0x63   : > { %s3072_s9 = scalar_select %p2714_p2, 1, 0 }
  0x64   : > { %s2703_s3 = scalar_lea.hbm %s3071_s1, %s2686_s18  ;;  %s2240_s26 = scalar_lea.hbm %s3071_s1, 256 }
  0x65   : > { %s2235_s20 = scalar_lea.hbm %s2703_s3, 128  ;;  %p2241_p10 = scmp.lt.u32.totalorder %s2703_s3, %s3071_s1 }
  0x66   : > { %p2236_p0 = scmp.ne.s32.totalorder %s2703_s3, %s2235_s20  ;;  %p2242_p13 = scmp.lt.u32.totalorder %s2240_s26, %s2235_s20 }
  0x67   : > { %p2244_p11 = scmp.lt.u32.totalorder %s2235_s20, %s2703_s3 }
  0x68   : > { %p2238_p4 = pnand %p2714_p2, %p2236_p0  ;;  %p2243_p1 = por %p2242_p13, %p2241_p10 }
  0x6a   : > { %p2239_p7 = pneg %p2238_p4  ;;  %p2245_p5 = por %p2244_p11, %p2243_p1 }
  0x6c   : > { %p2246_p9 = pnand %p2245_p5, %p2239_p7 }
  0x6e   : > { %2249 = shalt.err (!%p2246_p9)
}
  0x6f   : > { %s2250_s19 = scalar_lea.vmem %s2706_s8, 128  ;;  %s2481_s16 = smov [#allocation5]  }
  0x70   : > { %p2251_p0 = scmp.ne.s32.totalorder %s2706_s8, %s2250_s19  ;;  %s2255_s21 = sshll.u32 %s2481_s16, 4  ;;  %s2256_s21 = int_to_ptr.vmem [resolvable:$false] %s2255_s21 }
  0x71   : > { %s2257_s10 = scalar_lea.vmem %s2256_s21, 256  ;;  %p2258_p6 = scmp.lt.s32.totalorder %s2706_s8, %s2256_s21 }
  0x72   : > { %p2253_p4 = pnand %p2251_p0, %p2714_p2  ;;  %p2259_p8 = scmp.lt.s32.totalorder %s2257_s10, %s2250_s19 }
  0x74   : > { %p2254_p3 = pneg %p2253_p4  ;;  %p2260_p10 = por %p2259_p8, %p2258_p6 }
  0x76   : > { %p2261_p13 = pnand %p2260_p10, %p2254_p3 }
  0x78   : > { %2264 = shalt.err (!%p2261_p13)
}
  0x79   : > { %2085 = dma.hbm_to_vmem [thread:$0]  (!%p2694_p12), %s2703_s3, 128, %s2706_s8, %s2708_s22  }
  0x7a   : > { %s2482_s20 = smov [#allocation10]   ;;  %s2483_s5 = smov [#allocation13]  }
  0x7b   : > { %s284_s26 = sshll.u32 %s2482_s20, 4  ;;  %s310_s1 = sshll.u32 %s2483_s5, 4  ;;  %s285_s26 = int_to_ptr.vmem [resolvable:$true] %s284_s26  ;;  %s311_s1 = int_to_ptr.vmem [resolvable:$true] %s310_s1 }
  0x7c   : > { %s2265_s21 = scalar_lea.hbm %s3021_s4, 512  ;;  %p3073_p3 = scmp.ne.s32.totalorder %s3061_s23, 0 }
  0x7d   : > { %p2266_p1 = scmp.ne.s32.totalorder %s3021_s4, %s2265_s21  ;;  %p2272_p9 = scmp.lt.u32.totalorder %s2265_s21, %s3021_s4 }
  0x7f   : > { %p2268_p6 = pnand %p2266_p1, %p3073_p3 }
  0x81   : > { %p2269_p8 = pneg %p2268_p6 }
  0x83   : > { %p2274_p5 = pnand %p2272_p9, %p2269_p8 }
  0x85   : > { %2277 = shalt.err (!%p2274_p5)
}
  0x86   : > { %s2278_s3 = scalar_lea.vmem %s285_s26, 512  ;;  %p2286_p4 = scmp.lt.s32.totalorder %s285_s26, %s285_s26 }
  0x87   : > { %p2279_p11 = scmp.ne.s32.totalorder %s285_s26, %s2278_s3  ;;  %p2287_p10 = scmp.lt.s32.totalorder %s2278_s3, %s2278_s3 }
  0x89   : > { %p2281_p7 = pnand %p2279_p11, %p3073_p3  ;;  %p2288_p13 = por %p2287_p10, %p2286_p4 }
  0x8b   : > { %p2282_p0 = pneg %p2281_p7 }
  0x8d   : > { %p2289_p12 = pnand %p2288_p13, %p2282_p0 }
  0x8f   : > { %2292 = shalt.err (!%p2289_p12)
}
  0x90   : > { %p3074_p1 = scmp.ne.s32.totalorder %s3059_s15, 0  ;;  %s3075_s14 = smov 8  }
  0x91   : > { %s3076_s8 = smov 128   ;;  %s2293_s16 = scalar_lea.hbm %s3023_s6, 512 }
  0x92   : > { %2072 = dma.hbm_to_vmem [thread:$0]  (!%p3074_p1), %s3021_s4, 512, %s285_s26, [#allocation9], %s3076_s8, %s3076_s8, %s3075_s14  }
  0x93   : > { %p2294_p6 = scmp.ne.s32.totalorder %s3023_s6, %s2293_s16  ;;  %p2300_p9 = scmp.lt.u32.totalorder %s2293_s16, %s3023_s6 }
  0x95   : > { %p2296_p12 = pnand %p2294_p6, %p3073_p3 }
  0x97   : > { %p2297_p8 = pneg %p2296_p12 }
  0x99   : > { %p2302_p5 = pnand %p2300_p9, %p2297_p8 }
  0x9b   : > { %2305 = shalt.err (!%p2302_p5)
}
  0x9c   : > { %s2306_s7 = scalar_lea.vmem %s311_s1, 512  ;;  %p2314_p4 = scmp.lt.s32.totalorder %s311_s1, %s311_s1 }
  0x9d   : > { %p2307_p11 = scmp.ne.s32.totalorder %s311_s1, %s2306_s7  ;;  %p2315_p10 = scmp.lt.s32.totalorder %s2306_s7, %s2306_s7 }
  0x9f   : > { %p2309_p7 = pnand %p2307_p11, %p3073_p3  ;;  %p2316_p13 = por %p2315_p10, %p2314_p4 }
  0xa1   : > { %p2310_p0 = pneg %p2309_p7 }
  0xa3   : > { %p2317_p2 = pnand %p2316_p13, %p2310_p0 }
  0xa5   : > { %2320 = shalt.err (!%p2317_p2)
}
  0xa6   : > { %2078 = dma.hbm_to_vmem [thread:$0]  (!%p3074_p1), %s3023_s6, 512, %s311_s1, [#allocation12], %s3076_s8, %s3076_s8, %s3075_s14  }
  0xa7   : > { %s2784_s5 = scalar_lea.hbm %s3017_s0, %s2686_s18  ;;  %s331_s15 = scalar_lea.vmem [#allocation2], %s2690_s17 }
  0xa8   : > { %s339_s16 = sshll.u32 %s331_s15, 4  ;;  %s2793_s10 = scalar_lea.hbm %s3019_s2, %s2686_s18  ;;  %s2787_s16 = int_to_ptr.vmem [resolvable:$true] %s339_s16 }
  0xa9   : > { %s3077_s3 = sand.u32 1, %s2463_s29   ;;  %s2321_s14 = scalar_lea.hbm %s2784_s5, 128 }
  0xaa   : > { %s328_s1 = scalar_lea.sflag [#allocation3], %s3077_s3  ;;  %p2322_p2 = scmp.ne.s32.totalorder %s2784_s5, %s2321_s14 }
  0xab   : > { %p3078_p3 = scmp.ne.s32.totalorder %s3072_s9, 0  ;;  %s2326_s26 = scalar_lea.hbm %s3017_s0, 256 }
  0xac   : > { %p2327_p12 = scmp.lt.u32.totalorder %s2784_s5, %s3017_s0  ;;  %p2328_p8 = scmp.lt.u32.totalorder %s2326_s26, %s2321_s14 }
  0xad   : > { %p2324_p1 = pnand %p2322_p2, %p3078_p3  ;;  %p2330_p5 = scmp.lt.u32.totalorder %s2321_s14, %s2784_s5 }
  0xae   : > { %p2329_p9 = por %p2328_p8, %p2327_p12 }
  0xaf   : > { %p2325_p6 = pneg %p2324_p1 }
  0xb0   : > { %p2331_p11 = por %p2330_p5, %p2329_p9 }
  0xb2   : > { %p2332_p7 = pnand %p2331_p11, %p2325_p6 }
  0xb4   : > { %2335 = shalt.err (!%p2332_p7)
}
  0xb5   : > { %s2336_s18 = scalar_lea.vmem %s2787_s16, 128  ;;  %s2484_s20 = smov [#allocation2]  }
  0xb6   : > { %p2337_p0 = scmp.ne.s32.totalorder %s2787_s16, %s2336_s18  ;;  %s2341_s15 = sshll.u32 %s2484_s20, 4  ;;  %s2342_s15 = int_to_ptr.vmem [resolvable:$false] %s2341_s15 }
  0xb7   : > { %s2343_s21 = scalar_lea.vmem %s2342_s15, 256  ;;  %p2344_p13 = scmp.lt.s32.totalorder %s2787_s16, %s2342_s15 }
  0xb8   : > { %p2339_p4 = pnand %p2337_p0, %p3078_p3  ;;  %p2345_p2 = scmp.lt.s32.totalorder %s2343_s21, %s2336_s18 }
  0xba   : > { %p2340_p10 = pneg %p2339_p4  ;;  %p2346_p1 = por %p2345_p2, %p2344_p13 }
  0xbc   : > { %p2347_p12 = pnand %p2346_p1, %p2340_p10 }
  0xbe   : > { %2350 = shalt.err (!%p2347_p12)
}
  0xbf   : > { %p3079_p6 = scmp.ne.s32.totalorder %s3070_s13, 0  ;;  %s368_s19 = scalar_lea.vmem [#allocation7], %s2690_s17 }
  0xc0   : > { %s375_s3 = sshll.u32 %s368_s19, 4  ;;  %s2351_s14 = scalar_lea.hbm %s2793_s10, 128  ;;  %s376_s3 = int_to_ptr.vmem [resolvable:$true] %s375_s3 }
  0xc1   : > { %2082 = dma.hbm_to_vmem [thread:$0]  (!%p3079_p6), %s2784_s5, 128, %s2787_s16, %s328_s1  }
  0xc2   : > { %p2352_p8 = scmp.ne.s32.totalorder %s2793_s10, %s2351_s14  ;;  %s2356_s26 = scalar_lea.hbm %s3019_s2, 256 }
  0xc3   : > { %p2357_p11 = scmp.lt.u32.totalorder %s2793_s10, %s3019_s2  ;;  %p2358_p7 = scmp.lt.u32.totalorder %s2356_s26, %s2351_s14 }
  0xc4   : > { %p2354_p9 = pnand %p2352_p8, %p3078_p3  ;;  %p2360_p4 = scmp.lt.u32.totalorder %s2351_s14, %s2793_s10 }
  0xc5   : > { %p2359_p0 = por %p2358_p7, %p2357_p11 }
  0xc6   : > { %p2355_p5 = pneg %p2354_p9 }
  0xc7   : > { %p2361_p10 = por %p2360_p4, %p2359_p0 }
  0xc9   : > { %p2362_p13 = pnand %p2361_p10, %p2355_p5 }
  0xcb   : > { %2365 = shalt.err (!%p2362_p13)
}
  0xcc   : > { %s2366_s17 = scalar_lea.vmem %s376_s3, 128  ;;  %s2485_s5 = smov [#allocation7]  }
  0xcd   : > { %p2367_p2 = scmp.ne.s32.totalorder %s376_s3, %s2366_s17  ;;  %s2371_s16 = sshll.u32 %s2485_s5, 4  ;;  %s2372_s16 = int_to_ptr.vmem [resolvable:$false] %s2371_s16 }
  0xce   : > { %s2373_s1 = scalar_lea.vmem %s2372_s16, 256  ;;  %p2374_p8 = scmp.lt.s32.totalorder %s376_s3, %s2372_s16 }
  0xcf   : > { %p2369_p1 = pnand %p2367_p2, %p3078_p3  ;;  %p2375_p9 = scmp.lt.s32.totalorder %s2373_s1, %s2366_s17 }
  0xd1   : > { %p2370_p12 = pneg %p2369_p1  ;;  %p2376_p6 = por %p2375_p9, %p2374_p8 }
  0xd3   : > { %p2377_p7 = pnand %p2376_p6, %p2370_p12 }
  0xd5   : > { %2380 = shalt.err (!%p2377_p7)
}
  0xd6   : > { %p3080_p11 = scmp.ne.s32.totalorder %s3070_s13, 0  ;;  %p3081_p5 = scmp.ne.s32.totalorder %s3058_s12, 0 }
  0xd7   : > { %s2840_s9 = sand.u32 (!%p3081_p5), 1, %s2459_s28   ;;  %p3082_p3 = scmp.ne.s32.totalorder (!%p3081_p5), %s3065_s24, 0 }
  0xd8   : > { %2088 = dma.hbm_to_vmem [thread:$0]  (!%p3080_p11), %s2793_s10, 128, %s376_s3, %s2708_s22  }
  0xd9   : > { %384 = sbr.rel (%p3081_p5) target bundleno = 2817 (0xb01), region = 52  ;;  %s2843_s18 = sshll.u32 (!%p3081_p5), %s2840_s9, 3 }
  0xda   : > { %s387_s20 = scalar_lea.sflag (!%p3081_p5), [#allocation3], %s2840_s9  ;;  %s390_s15 = scalar_lea.vmem (!%p3081_p5), [#allocation2], %s2843_s18 }
  0xe0   : > { %2434 = dma.done.wait (%p3082_p3), %s387_s20, 128  }
  0xe1   : > { %2436 = vsyncadd (%p3082_p3), %s387_s20, 4294967168  ;;  %s395_s12 = sand.u32 1, %s2569_s11   ;;  %s399_s22 = scalar_lea.vmem [#allocation5], %s2843_s18 }
  0xe2   : > { %s396_s13 = scalar_lea.sflag [#allocation6], %s395_s12 }
  0xe3   : > { %2438 = dma.done.wait (%p3082_p3), %s396_s13, 256  }
  0xe4   : > { %2440 = vsyncadd (%p3082_p3), %s396_s13, 4294967040  ;;  %s408_s10 = scalar_lea.vmem [#allocation7], %s2843_s18  ;;  %p3083_p6 = scmp.eq.s32.totalorder %s2569_s11, 0 }
  0xe6   : > { %2442 = dma.done.wait (%p3083_p6), [#allocation9], 1024   ;;  %p3084_p0 = pmov %p3083_p6 }
  0xe8   : > { %2444 = vsyncadd (%p3084_p0), [#allocation9], 4294966272  ;;  %p3085_p4 = pmov %p3084_p0 }
  0xe9   : > { %p3086_p10 = pmov %p3084_p0 }
  0xea   : > { %2446 = dma.done.wait (%p3085_p4), [#allocation12], 1024  }
  0xeb   : > { %2448 = vsyncadd (%p3086_p10), [#allocation12], 4294966272  ;;  %v2486_v0 = vmov 0.0|0.0   ;;  %vm2487_vm0 = vmmov 0   ;;  %v2488_v1 = vmov 0.0   ;;  %v548_v2 = vld [vmem:[#allocation10] sm:$0xff] }
  0xec   : > { %2030 = vmatprep.subr.bf16.mxu1 %v2486_v0  ;;  %2024 = vmatprep.subr.bf16.mxu0 %v2486_v0  ;;  %v549_v3 = vld [vmem:[#allocation10 + $0x8] sm:$0xff]  ;;  %v470_v4 = vld [vmem:[#allocation8] sm:$0xff]  ;;  %v550_v7 = vld [vmem:[#allocation10 + $0x10] sm:$0xff]  ;;  %vm474_vm1 = vcmask 261120   ;;  %vm702_vm2 = vcmask 64512   ;;  %s2489_s11 = smov 120  }
  0xed   : > { %1950 = vmatprep.mubr.msk.f32.mxu1 %vm2487_vm0, %v2488_v1  ;;  %1939 = vmatprep.mubr.msk.f32.mxu0 %vm2487_vm0, %v2488_v1  ;;  %v2031_v5 = vpack.c.bf16 %v549_v3, %v548_v2  ;;  %v471_v6 = vld [vmem:[#allocation8 + $0x8] sm:$0xff]  ;;  %v551_v8 = vld [vmem:[#allocation10 + $0x18] sm:$0xff]  ;;  %v472_v10 = vld [vmem:[#allocation8 + $0x10] sm:$0xff]  ;;  %s2490_s24 = smov 112   ;;  %s2491_s21 = smov 104  }
  0xee   : > { %v2025_v9 = vpack.c.bf16 %v471_v6, %v470_v4  ;;  %v473_v11 = vld [vmem:[#allocation8 + $0x18] sm:$0xff]  ;;  %v2034_v12 = vpack.c.bf16 %v551_v8, %v550_v7  ;;  %v468_v14 = vld [vmem:[%s399_s22] sm:$0xff]  ;;  %v627_v18 = vld [vmem:[#allocation11 + $0x10] sm:$0xff]  ;;  %s3087_s14 = sld [smem:[#allocation29_spill]]  ;;  %s1889_s8 = sshll.u32 %s2467_s30, 7 }
  0xef   : > { %2032 = vmatpush3.bf16.msra.mxu1 %v2031_v5  ;;  %v2028_v13 = vpack.c.bf16 %v473_v11, %v472_v10  ;;  %v467_v15 = vld [vmem:[%s390_s15] sm:$0xff]  ;;  %v625_v16 = vld [vmem:[#allocation11] sm:$0xff]  ;;  %v626_v17 = vld [vmem:[#allocation11 + $0x8] sm:$0xff]  ;;  %s466_s7 = scalar_lea.vmem [#allocation14], %s2843_s18  ;;  %s3088_s17 = sld [smem:[#allocation30_spill]] }
  0xf0   : > { %2026 = vmatpush3.bf16.msra.mxu0 %v2025_v9  ;;  %2033 = vmatprep.subr.bf16.mxu1 %v2486_v0  ;;  %v2037_v19 = vpack.c.bf16 %v626_v17, %v625_v16  ;;  %v628_v20 = vld [vmem:[#allocation11 + $0x18] sm:$0xff]  ;;  %v1031_v50 = vld [vmem:[#allocation13 + $0x8] sm:$0xff]  ;;  %v863_v55 = vld [vmem:[#allocation13] sm:$0xff]  ;;  %s1684_s26 = sshll.u32 %s466_s7, 4  ;;  %s1670_s16 = scalar_lea.sflag [#allocation4], %s2840_s9  ;;  %s2969_s26 = int_to_ptr.vmem [resolvable:$true] %s1684_s26 }
  0xf1   : > { %2027 = vmatprep.subr.bf16.mxu0 %v2486_v0  ;;  %v2040_v21 = vpack.c.bf16 %v628_v20, %v627_v18  ;;  %v469_v22 = vld [vmem:[%s408_s10] sm:$0xff]  ;;  %s2381_s1 = scalar_lea.vmem %s2969_s26, 128  ;;  %p3089_p2 = scmp.ne.s32.totalorder %s3066_s25, 0 }
  0xf2   : > { %v1344_v18 = vld [vmem:[#allocation13 + $0x10] sm:$0xff]  ;;  %p2382_p13 = scmp.ne.s32.totalorder %s2969_s26, %s2381_s1  ;;  %s2492_s30 = smov [#allocation14]  }
  0xf3   : > { %2035 = vmatpush3.bf16.msra.mxu1 %v2034_v12  ;;  %s2385_s18 = sshll.u32 %s2492_s30, 4  ;;  %s2386_s18 = int_to_ptr.vmem [resolvable:$false] %s2385_s18 }
  0xf4   : > { %2029 = vmatpush3.bf16.msra.mxu0 %v2028_v13  ;;  %1964 = vmatprep.subr.mxu1 %v2488_v1  ;;  %p2383_p1 = pnand %p2382_p13, %p3089_p2  ;;  %s2387_s20 = scalar_lea.vmem %s2386_s18, 256 }
  0xf5   : > { %2036 = vmatprep.subr.bf16.mxu0 %v2486_v0  ;;  %s2967_s5 = scalar_lea.hbm %s3088_s17, %s1889_s8  ;;  %p2388_p8 = scmp.lt.s32.totalorder %s2969_s26, %s2386_s18 }
  0xf6   : > { %1951 = vmatmul.mubr.msk.f32.vlgmr.msra.gmra.mrb[0].mxu1 %vm474_vm1, %v468_v14  ;;  %p2384_p12 = pneg %p2383_p1  ;;  %p2389_p9 = scmp.lt.s32.totalorder %s2387_s20, %s2381_s1 }
  0xf7   : > { %1940 = vmatmul.mubr.msk.f32.vlgmr.msra.gmra.mrb[0].mxu0 %vm474_vm1, %v467_v15  ;;  %1966 = vmatprep.mubr.msk.f32.mxu1 %vm2487_vm0, %v2488_v1 }
  0xf8   : > { %1961 = vmatprep.mubr.msk.f32.mxu0 %vm2487_vm0, %v2488_v1  ;;  %2038 = vmatpush3.bf16.msra.mxu0 %v2037_v19  ;;  %p2390_p7 = por %p2389_p9, %p2388_p8 }
  0xf9   : > { %2039 = vmatprep.subr.bf16.mxu0 %v2486_v0 }
  0xfa   : > { %p2391_p11 = pnand %p2390_p7, %p2384_p12 }
  0xfc   : > { %2041 = vmatpush3.bf16.msra.mxu0 %v2040_v21 }
  0xfd   : > { %1974 = vmatprep.subr.mxu0 %v2488_v1 }
  0xff   : > { %1962 = vmatmul.mubr.msk.f32.vlgmr.msra.gmra.mrb[2].mxu0 %vm474_vm1, %v469_v22 }
 0x100   : > { %1976 = vmatprep.mubr.msk.f32.mxu0 %vm2487_vm0, %v2488_v1 }
 0x1c9   : > { %v621_v23 = vpop.f32.mrb[0].mxu1 }
 0x1ca   : > { %866 = vrot.lane.b32.xlu0 %v621_v23, %s2489_s11  ;;  %v1952_v24 = vpop.f32.mrb[1].mxu1  ;;  %1965 = vmatpush3.xpose.msk.msra.mxu1 %vm702_vm2, %v621_v23  ;;  %v2889_v25 = vpop.f32.mrb[0].mxu0 }
 0x1cb   : > { %v1941_v26 = vpop.f32.mrb[1].mxu0  ;;  %1969 = vmatprep.subr.mxu1 %v2488_v1 }
 0x1cd   : > { %1967 = vmatmul.mubr.msk.f32.vlgmr.msra.gmra.mrb[2].mxu1 %vm702_vm2, %v2889_v25 }
 0x1ce   : > { %864 = vrot.lane.b32.xlu0 %v2889_v25, %s2489_s11  ;;  %1971 = vmatprep.mubr.msk.f32.mxu1 %vm2487_vm0, %v2488_v1 }
 0x1d2   : > { %v2903_v29 = vpop.f32.mrb[2].mxu0 }
 0x1d3   : > { %v1963_v30 = vpop.f32.mrb[3].mxu0  ;;  %1970 = vmatpush3.msra.mxu1 %v2903_v29 }
 0x1d4   : > { %1979 = vmatprep.subr.mxu1 %v2488_v1  ;;  %v1585_v30 = vld [vmem:[#allocation13 + $0x18] sm:$0xff] }
 0x23c   : > { %v867_v27 = vpop.permute.xlu0 %866 }
 0x23d   : > { %1975 = vmatpush3.xpose.msk.msra.mxu0 %vm702_vm2, %v867_v27 }
 0x23e   : > { %1984 = vmatprep.subr.mxu0 %v2488_v1 }
 0x240   : > { %v865_v28 = vpop.permute.xlu0 %864 }
 0x241   : > { %1977 = vmatmul.mubr.msk.f32.vlgmr.msra.gmra.mrb[4].mxu0 %vm702_vm2, %v865_v28 }
 0x242   : > { %1986 = vmatprep.mubr.msk.f32.mxu0 %vm2487_vm0, %v2488_v1  ;;  %1985 = vmatpush3.msra.mxu0 %v1031_v50 }
 0x243   : > { %1994 = vmatprep.subr.mxu0 %v2488_v1 }
 0x2a0   : > { %v775_v31 = vpop.f32.mrb[2].mxu1 }
 0x2a1   : > { %v1968_v32 = vpop.f32.mrb[3].mxu1  ;;  %v779_v33 = vsel %vm702_vm2, %v775_v31, -inf }
 0x2a2   : > { %780 = vmax.xlane.f32.xlu1 %v779_v33 }
 0x314   : > { %v938_v34 = vpop.f32.mrb[4].mxu0 }
 0x315   : > { %v1978_v35 = vpop.f32.mrb[5].mxu0  ;;  %v942_v36 = vsel %vm702_vm2, %v938_v34, -inf }
 0x316   : > { %943 = vmax.xlane.f32.xlu1 %v942_v36 }
 0x32f   : > { %v781_v37 = vpop.xlane.xlu1 %780 }
 0x330   : > { %v782_v38 = vsub.f32 %v775_v31, %v781_v37 }
 0x332   : > { %v783_v39 = vmul.f32 1.442695, %v782_v38 }
 0x334   : > { %2163 = vpow2.f32 %v783_v39  ;;  %v1887_v39 = vld [vmem:[%s3087_s14] ss:$0 sm:$0xff] }
 0x33e   : > { %v2164_v40 = vpop.eup %2163 }
 0x33f   : > { %v785_v41 = vsel %vm702_vm2, %v2164_v40, 0.0 }
 0x340   : > { %786 = vadd.xlane.f32.xlu0 %v785_v41 }
 0x356   : > { %1267 = vrot.lane.b32.xlu0 %v2903_v29, %s2490_s24 }
 0x35a   : > { %1421 = vrot.lane.b32.xlu0 %v621_v23, %s2491_s21 }
 0x3a3   : > { %v944_v42 = vpop.xlane.xlu1 %943 }
 0x3a4   : > { %v945_v43 = vsub.f32 %v938_v34, %v944_v42 }
 0x3a6   : > { %v946_v44 = vmul.f32 1.442695, %v945_v43 }
 0x3a8   : > { %2165 = vpow2.f32 %v946_v44 }
 0x3b2   : > { %v2166_v45 = vpop.eup %2165 }
 0x3b3   : > { %v948_v46 = vsel %vm702_vm2, %v2166_v45, 0.0 }
 0x3b4   : > { %949 = vadd.xlane.f32.xlu1 %v948_v46 }
 0x3c5   : > { %954 = vrot.lane.b32.xlu1 %v2903_v29, %s2489_s11 }
 0x3c9   : > { %1180 = vrot.lane.b32.xlu1 %v621_v23, %s2490_s24 }
 0x3cd   : > { %v787_v47 = vpop.xlane.xlu0 %786  ;;  %1178 = vrot.lane.b32.xlu1 %v2889_v25, %s2490_s24 }
 0x3ce   : > { %2167 = vrcp.f32 %v787_v47 }
 0x3d1   : > { %v1268_v57 = vpop.permute.xlu0 %1267 }
 0x3d5   : > { %v1422_v13 = vpop.permute.xlu0 %1421 }
 0x3d8   : > { %v2168_v48 = vpop.eup %2167 }
 0x3d9   : > { %v789_v49 = vmul.f32 %v2168_v48, %v2164_v40 }
 0x3db   : > { %1972 = vmatmul.mubr.msk.f32.vlgmr.msra.gmra.mrb[4].mxu1 %vm702_vm2, %v789_v49 }
 0x3dc   : > { %1981 = vmatprep.mubr.msk.f32.mxu1 %vm2487_vm0, %v2488_v1 }
 0x441   : > { %v950_v51 = vpop.xlane.xlu1 %949 }
 0x442   : > { %2169 = vrcp.f32 %v950_v51 }
 0x445   : > { %v955_v52 = vpop.permute.xlu1 %954 }
 0x446   : > { %1980 = vmatpush3.msra.mxu1 %v955_v52 }
 0x447   : > { %1989 = vmatprep.subr.mxu1 %v2488_v1 }
 0x449   : > { %v1181_v59 = vpop.permute.xlu1 %1180 }
 0x44c   : > { %v2170_v53 = vpop.eup %2169 }
 0x44d   : > { %v952_v54 = vmul.f32 %v2170_v53, %v2166_v45  ;;  %v1179_v62 = vpop.permute.xlu1 %1178 }
 0x44f   : > { %1982 = vmatmul.mubr.msk.f32.vlgmr.msra.gmra.mrb[6].mxu1 %vm702_vm2, %v952_v54 }
 0x450   : > { %1990 = vmatpush3.msra.mxu1 %v863_v55  ;;  %1991 = vmatprep.mubr.msk.f32.mxu1 %vm2487_vm0, %v2488_v1 }
 0x451   : > { %1999 = vmatprep.subr.mxu1 %v2488_v1 }
 0x4ae   : > { %v859_v56 = vpop.f32.mrb[4].mxu1 }
 0x4af   : > { %v1973_v58 = vpop.f32.mrb[5].mxu1  ;;  %1992 = vmatmul.mubr.msk.f32.vlgmr.msra.gmra.mrb[8].mxu1 %vm702_vm2, %v859_v56 }
 0x4b0   : > { %2000 = vmatpush3.msra.mxu1 %v1268_v57  ;;  %2001 = vmatprep.mubr.msk.f32.mxu1 %vm2487_vm0, %v2488_v1 }
 0x4b1   : > { %2009 = vmatprep.subr.mxu1 %v2488_v1 }
 0x522   : > { %v1026_v60 = vpop.f32.mrb[6].mxu1 }
 0x523   : > { %v1983_v61 = vpop.f32.mrb[7].mxu1  ;;  %1987 = vmatmul.mubr.msk.f32.vlgmr.msra.gmra.mrb[6].mxu0 %vm702_vm2, %v1026_v60 }
 0x524   : > { %1995 = vmatpush3.xpose.msk.msra.mxu0 %vm702_vm2, %v1181_v59  ;;  %1996 = vmatprep.mubr.msk.f32.mxu0 %vm2487_vm0, %v2488_v1 }
 0x525   : > { %2004 = vmatprep.subr.mxu0 %v2488_v1 }
 0x527   : > { %1997 = vmatmul.mubr.msk.f32.vlgmr.msra.gmra.mrb[8].mxu0 %vm702_vm2, %v1179_v62 }
 0x528   : > { %2006 = vmatprep.mubr.msk.f32.mxu0 %vm2487_vm0, %v2488_v1  ;;  %2005 = vmatpush3.msra.mxu0 %v1344_v18 }
 0x529   : > { %2014 = vmatprep.subr.mxu0 %v2488_v1 }
 0x582   : > { %v1174_v63 = vpop.f32.mrb[8].mxu1 }
 0x583   : > { %v1993_v0 = vpop.f32.mrb[9].mxu1 }
 0x5f6   : > { %v1101_v2 = vpop.f32.mrb[6].mxu0 }
 0x5f7   : > { %v1175_v3 = vadd.f32 %v1174_v63, %v1101_v2  ;;  %v1988_v4 = vpop.f32.mrb[7].mxu0 }
 0x5fa   : > { %v1252_v5 = vpop.f32.mrb[8].mxu0 }
 0x5fb   : > { %v1998_v6 = vpop.f32.mrb[9].mxu0  ;;  %v1256_v7 = vsel %vm702_vm2, %v1252_v5, -inf }
 0x5fc   : > { %1257 = vmax.xlane.f32.xlu1 %v1256_v7 }
 0x689   : > { %v1258_v8 = vpop.xlane.xlu1 %1257 }
 0x68a   : > { %v1259_v9 = vsub.f32 %v1252_v5, %v1258_v8 }
 0x68c   : > { %v1260_v10 = vmul.f32 1.442695, %v1259_v9 }
 0x68e   : > { %2171 = vpow2.f32 %v1260_v10 }
 0x698   : > { %v2172_v11 = vpop.eup %2171 }
 0x699   : > { %v1262_v12 = vsel %vm702_vm2, %v2172_v11, 0.0 }
 0x69a   : > { %1263 = vadd.xlane.f32.xlu0 %v1262_v12 }
 0x6b0   : > { %1419 = vrot.lane.b32.xlu0 %v2889_v25, %s2491_s21 }
 0x727   : > { %v1264_v14 = vpop.xlane.xlu0 %1263 }
 0x728   : > { %2173 = vrcp.f32 %v1264_v14 }
 0x72b   : > { %v1420_v17 = vpop.permute.xlu0 %1419 }
 0x732   : > { %v2174_v15 = vpop.eup %2173 }
 0x733   : > { %v1266_v16 = vmul.f32 %v2174_v15, %v2172_v11 }
 0x735   : > { %2002 = vmatmul.mubr.msk.f32.vlgmr.msra.gmra.mrb[10].mxu1 %vm702_vm2, %v1266_v16 }
 0x736   : > { %2010 = vmatpush3.xpose.msk.msra.mxu1 %vm702_vm2, %v1422_v13  ;;  %2011 = vmatprep.mubr.msk.f32.mxu1 %vm2487_vm0, %v2488_v1 }
 0x737   : > { %2019 = vmatprep.subr.mxu1 %v2488_v1 }
 0x739   : > { %2012 = vmatmul.mubr.msk.f32.vlgmr.msra.gmra.mrb[12].mxu1 %vm702_vm2, %v1420_v17 }
 0x73a   : > { %2021 = vmatprep.mubr.msk.f32.mxu1 %vm2487_vm0, %v2488_v1  ;;  %2020 = vmatpush3.msra.mxu1 %v1585_v30 }
 0x808   : > { %v1339_v19 = vpop.f32.mrb[10].mxu1 }
 0x809   : > { %v2003_v20 = vpop.f32.mrb[11].mxu1  ;;  %2007 = vmatmul.mubr.msk.f32.vlgmr.msra.gmra.mrb[10].mxu0 %vm702_vm2, %v1339_v19 }
 0x80a   : > { %2016 = vmatprep.mubr.msk.f32.mxu0 %vm2487_vm0, %v2488_v1 }
 0x80c   : > { %v1493_v21 = vpop.f32.mrb[12].mxu1 }
 0x80d   : > { %v2013_v22 = vpop.f32.mrb[13].mxu1  ;;  %v1497_v23 = vsel %vm702_vm2, %v1493_v21, -inf }
 0x80e   : > { %1498 = vmax.xlane.f32.xlu0 %v1497_v23 }
 0x89b   : > { %v1499_v24 = vpop.xlane.xlu0 %1498 }
 0x89c   : > { %v1500_v25 = vsub.f32 %v1493_v21, %v1499_v24 }
 0x89e   : > { %v1501_v26 = vmul.f32 1.442695, %v1500_v25 }
 0x8a0   : > { %2175 = vpow2.f32 %v1501_v26 }
 0x8aa   : > { %v2176_v27 = vpop.eup %2175 }
 0x8ab   : > { %v1503_v28 = vsel %vm702_vm2, %v2176_v27, 0.0 }
 0x8ac   : > { %1504 = vadd.xlane.f32.xlu1 %v1503_v28 }
 0x8bd   : > { %1508 = vrot.lane.b32.xlu1 %v2903_v29, %s2491_s21 }
 0x8dc   : > { %v1414_v1 = vpop.f32.mrb[10].mxu0 }
 0x8dd   : > { %v1418_v31 = vadd.f32 %v1414_v1, %v1175_v3  ;;  %v2008_v32 = vpop.f32.mrb[11].mxu0 }
 0x939   : > { %v1505_v33 = vpop.xlane.xlu1 %1504 }
 0x93a   : > { %2177 = vrcp.f32 %v1505_v33 }
 0x93d   : > { %v1509_v34 = vpop.permute.xlu1 %1508 }
 0x93e   : > { %2015 = vmatpush3.msra.mxu0 %v1509_v34 }
 0x944   : > { %v2178_v35 = vpop.eup %2177 }
 0x945   : > { %v1507_v36 = vmul.f32 %v2178_v35, %v2176_v27 }
 0x947   : > { %2017 = vmatmul.mubr.msk.f32.vlgmr.msra.gmra.mrb[12].mxu0 %vm702_vm2, %v1507_v36 }
 0xa1a   : > { %v1580_v37 = vpop.f32.mrb[12].mxu0 }
 0xa1b   : > { %v2018_v38 = vpop.f32.mrb[13].mxu0  ;;  %2022 = vmatmul.mubr.msk.f32.vlgmr.msra.gmra.mrb[14].mxu1 %vm702_vm2, %v1580_v37 }
 0xaee   : > { %v1655_v29 = vpop.f32.mrb[14].mxu1 }
 0xaef   : > { %v1659_v40 = vadd.f32 %v1655_v29, %v1418_v31  ;;  %v2023_v41 = vpop.f32.mrb[15].mxu1 }
 0xaf1   : > { %v1667_v42 = vadd.f32 %v1887_v39, %v1659_v40 }
 0xaf3   : > { %1668 = vst.msk [vmem:[%s466_s7] sm:$0xff] %vm474_vm1, %v1667_v42 }
 0xaf4   : > { %2394 = shalt.err (!%p2391_p11)
}
 0xaf5   : > { %s2395_s9 = scalar_lea.hbm %s2967_s5, 128  ;;  %s2399_s13 = scalar_lea.hbm %s3088_s17, 256 }
 0xaf6   : > { %p2396_p5 = scmp.ne.s32.totalorder %s2967_s5, %s2395_s9  ;;  %p2400_p0 = scmp.lt.u32.totalorder %s2967_s5, %s3088_s17 }
 0xaf7   : > { %p2401_p4 = scmp.lt.u32.totalorder %s2399_s13, %s2395_s9  ;;  %p2403_p13 = scmp.lt.u32.totalorder %s2395_s9, %s2967_s5 }
 0xaf8   : > { %p2397_p3 = pnand %p2396_p5, %p3089_p2 }
 0xaf9   : > { %p2402_p10 = por %p2401_p4, %p2400_p0 }
 0xafa   : > { %p2398_p6 = pneg %p2397_p3 }
 0xafb   : > { %p2404_p1 = por %p2403_p13, %p2402_p10 }
 0xafd   : > { %p2405_p12 = pnand %p2404_p1, %p2398_p6 }
 0xaff   : > { %2408 = shalt.err (!%p2405_p12)
}
 0xb00   : > { %2064 = dma.vmem_to_hbm [thread:$0]  (%p3089_p2), %s2969_s26, 128, %s2967_s5, %s1670_s16  }
 0xb01 PF: > { %s3090_s11 = sld [smem:[#allocation20_spill]]  ;;  %s3091_s24 = sld [smem:[#allocation25_spill]] }
 0xb02   : > { %s3092_s21 = sld [smem:[#allocation22_spill]] }
 0xb07   : > { %s1696_s19 = sand.u32 1, %s3090_s11   ;;  %p3093_p8 = scmp.ne.s32.totalorder %s3091_s24, 0 }
 0xb08   : > { %p3094_p9 = scmp.ge.s32.totalorder %s3092_s21, 2  ;;  %s1697_s3 = scalar_lea.sflag [#allocation4], %s1696_s19 }
 0xb0a   : > { %p2090_p7 = pnand %p3094_p9, %p3093_p8 }
 0xb0c   : > { %2450 = dma.done.wait (!%p2090_p7), %s1697_s3, 128  }
 0xb0d   : > { %2452 = vsyncadd (!%p2090_p7), %s1697_s3, 4294967168  ;;  %s29_s10 = sadd.s32 1, %s3092_s21   ;;  %s3095_s25 = sld [smem:[#allocation24_spill]] }
 0xb0e   : > { %p26_p11 = scmp.ge.s32.totalorder %s29_s10, 4   ;;  %s3096_s30 = sld [smem:[#allocation21_spill]] }
 0xb0f   : > { %s3097_s9 = sld [smem:[#allocation23_spill]]  ;;  %s3098_s27 = smov %s2459_s28 }
 0xb10   : > { %s3099_s28 = smov %s2463_s29  ;;  %28 = sbr.rel (!%p26_p11) target bundleno = 16 (0x10), region = 140 }
 0xb13   : > { %s3100_s29 = smov %s3095_s25 }
 0xb17   :  { %1702 = vsyncpa [#allocation3], 1 }
 0xb18   :  { %1704 = vsyncpa [#allocation3 + $0x1], 1 }
 0xb19   :  { %1705 = vsyncpa [#allocation6], 1 }
 0xb1a   :  { %1707 = vsyncpa [#allocation6 + $0x1], 1 }
 0xb1b   :  { %1708 = vsyncpa [#allocation9], 1 }
 0xb1c   :  { %1709 = vsyncpa [#allocation12], 1 }
 0xb1d   :  { %1710 = vsyncpa [#allocation4], 1 }
 0xb1e   :  { %1712 = vsyncpa [#allocation4 + $0x1], 1 }

</bundles_post_ra>
